<compile_context>
chip_gen: v5e
topology: v5e:2x2
jax: 0.10.0
libtpu: 0.0.40
codegen_flags: <defaults>
</compile_context>

<pallas_src>
import functools

import jax
import jax.numpy as jnp
from jax.experimental import pallas as pl
from jax.experimental.pallas import tpu as pltpu

LANE = 128
SUBLANE = 8


def _sublane_multiple(dtype):
    """Second-minor tiling requirement for a packed dtype (8/16/32 rows)."""
    itemsize = jnp.dtype(dtype).itemsize
    return SUBLANE * max(1, 4 // itemsize)


def _focal_elements(x, t, alpha, gamma):
    """Per-element focal loss in f32 (used for the tiny unaligned tail + ref)."""
    x = x.astype(jnp.float32)
    t = t.astype(jnp.float32)
    bce = jnp.maximum(x, 0.0) - x * t + jnp.log1p(jnp.exp(-jnp.abs(x)))
    pt = jnp.exp(-bce)
    return alpha * (1.0 - pt) ** gamma * bce


def _focal_loss_kernel(x_ref, t_ref, out_ref, *,
                       alpha, gamma, rows_valid, block_rows, steps_per_core):
    c = pl.program_id(0)          # TensorCore shard
    i = pl.program_id(1)          # streaming step within the shard

    @pl.when(i == 0)
    def _():
        out_ref[...] = jnp.zeros_like(out_ref)

    # Global (un-clamped) row index of this tile's first row.  The index_map is
    # clamped to stay in bounds; duplicated tiles are zeroed out by the mask.
    block_row0 = (c * steps_per_core + i) * block_rows

    def focal_of(x, t):
        # Numerically-stable BCE-with-logits (matches torch reduction='none'):
        #   bce = max(x, 0) - x*t + log(1 + exp(-|x|))
        bce = jnp.maximum(x, 0.0) - x * t + jnp.log1p(jnp.exp(-jnp.abs(x)))
        pt = jnp.exp(-bce)
        w = 1.0 - pt
        if float(gamma) == 2.0:     # default: keep the power off the (busy) EUP
            wg = w * w
        elif float(gamma) == 1.0:
            wg = w
        else:
            wg = w ** gamma
        return alpha * wg * bce

    def accumulate(focal):
        # vreg-shaped accumulation: reduce the tile to one (8, 128) partial with
        # VPU adds; the single cross-lane reduce happens in the wrapper.
        partial = focal.reshape(block_rows // SUBLANE, SUBLANE, LANE).sum(axis=0)
        out_ref[...] = out_ref[...] + partial[None, :, :]

    @pl.when(block_row0 + block_rows <= rows_valid)
    def _():
        # Hot path: every row of the tile is valid -> no mask arithmetic.
        x = x_ref[...].astype(jnp.float32)
        t = t_ref[...].astype(jnp.float32)
        accumulate(focal_of(x, t))

    @pl.when(block_row0 + block_rows > rows_valid)
    def _():
        # Boundary tile (partial last block) or duplicated tile from the
        # clamped index_map: row-level validity mask, sanitized inputs so
        # Pallas partial-block garbage cannot produce NaN/Inf.
        x = x_ref[...].astype(jnp.float32)
        t = t_ref[...].astype(jnp.float32)
        row = jax.lax.broadcasted_iota(jnp.int32, (block_rows, LANE), 0)
        valid = (block_row0 + row) < rows_valid
        x = jnp.where(valid, x, 0.0)
        t = jnp.where(valid, t, 0.0)
        accumulate(jnp.where(valid, focal_of(x, t), 0.0))


def focal_loss(inputs, targets, *, alpha=0.25, gamma=2.0, block_rows=None):
    assert inputs.shape == targets.shape
    n = inputs.size

    x = inputs.reshape(-1)      # keep native dtype; cast happens in-kernel
    t = targets.reshape(-1)

    row_mult = max(_sublane_multiple(x.dtype), _sublane_multiple(t.dtype))
    align = row_mult * LANE
    n_main = (n // align) * align      # prefix streamed through the kernel

    if block_rows is None:
        kind = jax.devices()[0].device_kind.lower()
        # 8192 rows = 16 MiB of double-buffered f32 input tiles (fits v6e/v7x
        # 32 MiB scoped default); 4096 on v5e (16 MiB scoped default).
        block_rows = 8192 if ("v6" in kind or "v7" in kind) else 4096

    total = jnp.zeros((), jnp.float32)

    if n_main:
        rows = n_main // LANE                     # multiple of row_mult
        br = min(int(block_rows), rows)
        br -= br % row_mult                       # keep packed-dtype tiling legal

        num_blocks = pl.cdiv(rows, br)
        num_cores = 2 if num_blocks >= 2 else 1   # v7x TC split; harmless elsewhere
        steps_per_core = pl.cdiv(num_blocks, num_cores)

        x2 = (x if n_main == n else jax.lax.slice(x, (0,), (n_main,))).reshape(rows, LANE)
        t2 = (t if n_main == n else jax.lax.slice(t, (0,), (n_main,))).reshape(rows, LANE)

        def in_map(c, i):
            # Clamp so the DMA window never leaves the array; duplicated blocks
            # are zeroed in-kernel via the row mask.
            return (jnp.minimum(c * steps_per_core + i, num_blocks - 1), 0)

        kernel = functools.partial(
            _focal_loss_kernel,
            alpha=float(alpha), gamma=float(gamma),
            rows_valid=rows, block_rows=br, steps_per_core=steps_per_core)

        # 2 inputs x 2 pipeline buffers x tile bytes, plus headroom.
        itemsize = jnp.dtype(x.dtype).itemsize + jnp.dtype(t.dtype).itemsize
        vmem_bytes = 2 * br * LANE * itemsize + (4 << 20)

        partials = pl.pallas_call(
            kernel,
            out_shape=jax.ShapeDtypeStruct((num_cores, SUBLANE, LANE), jnp.float32),
            grid_spec=pltpu.PrefetchScalarGridSpec(
                num_scalar_prefetch=0,
                grid=(num_cores, steps_per_core),
                in_specs=[
                    pl.BlockSpec((br, LANE), in_map),
                    pl.BlockSpec((br, LANE), in_map),
                ],
                out_specs=pl.BlockSpec((1, SUBLANE, LANE), lambda c, i: (c, 0, 0)),
            ),
            compiler_params=pltpu.CompilerParams(
                dimension_semantics=("parallel", "arbitrary"),
                vmem_limit_bytes=int(vmem_bytes)),
        )(x2, t2)
        total = total + jnp.sum(partials)

    if n_main != n:
        # Tiny unaligned tail (< row_mult*128 elements) folded in with plain JAX
        # instead of an O(N) pad/concatenate of the full streams.
        total = total + jnp.sum(
            _focal_elements(x[n_main:], t[n_main:], float(alpha), float(gamma)))

    return total / n


def focal_loss_ref(inputs, targets, alpha=0.25, gamma=2.0):
    return jnp.mean(_focal_elements(inputs, targets, alpha, gamma))


if __name__ == "__main__":
    key = jax.random.PRNGKey(0)
    k1, k2 = jax.random.split(key)

    # 1) Small shape consistent with a typical dense-prediction use of FocalLoss.
    shape = (2, 4, 16, 16)  # NCHW logits
    inputs = jax.random.normal(k1, shape, dtype=jnp.float32) * 2.0
    targets = jax.random.bernoulli(k2, p=0.3, shape=shape).astype(jnp.float32)

    loss = jax.block_until_ready(focal_loss(inputs, targets))
    ref = jax.block_until_ready(focal_loss_ref(inputs, targets))
    assert jnp.allclose(loss, ref, rtol=1e-5, atol=1e-6), (loss, ref)

    # 2) Native bf16 logits + hard bf16 targets (exercises packed-dtype tiling,
    #    the lower-HBM-bytes path recommended for v5e/v6e).
    shape_bf = (4, 3, 32, 32)
    x_bf = (jax.random.normal(k1, shape_bf, dtype=jnp.float32) * 2.0).astype(jnp.bfloat16)
    t_bf = jax.random.bernoulli(k2, p=0.4, shape=shape_bf).astype(jnp.bfloat16)
    loss_bf = jax.block_until_ready(focal_loss(x_bf, t_bf))
    ref_bf = jax.block_until_ready(focal_loss_ref(x_bf, t_bf))
    assert jnp.allclose(loss_bf, ref_bf, rtol=1e-5, atol=1e-6), (loss_bf, ref_bf)

    # 3) Non-aligned size + small explicit tile so the 2-core grid, the masked
    #    boundary tile, the clamped duplicated tile, and the plain-JAX tail path
    #    are all exercised.
    n_odd = 199_999
    x_odd = jax.random.normal(k1, (n_odd,), dtype=jnp.float32) * 2.0
    t_odd = jax.random.bernoulli(k2, p=0.3, shape=(n_odd,)).astype(jnp.float32)
    loss_odd = jax.block_until_ready(focal_loss(x_odd, t_odd, block_rows=256))
    ref_odd = jax.block_until_ready(focal_loss_ref(x_odd, t_odd))
    assert jnp.allclose(loss_odd, ref_odd, rtol=1e-4, atol=1e-7), (loss_odd, ref_odd)

    print("KERNEL_OK")
</pallas_src>

<mosaic_0001>
module attributes {stable_mosaic.version = 11 : i64} {
  func.func @_focal_loss_kernel(%arg0: i32, %arg1: i32, %arg2: memref<16x128xf32, #tpu.memory_space<vmem>>, %arg3: memref<16x128xf32, #tpu.memory_space<vmem>>, %arg4: memref<1x8x128xf32, #tpu.memory_space<vmem>>) attributes {dimension_semantics = [#tpu.dimension_semantics<parallel>, #tpu.dimension_semantics<arbitrary>], iteration_bounds = array<i64: 1, 1>, scalar_prefetch = 0 : i64, scratch_operands = 0 : i64, tpu.core_type = #tpu.core_type<tc>, window_params = [{transform_indices = @transform_0, window_bounds = array<i64: 16, 128>}, {transform_indices = @transform_1, window_bounds = array<i64: 16, 128>}, {transform_indices = @transform_2, window_bounds = array<i64: 1, 8, 128>}]} {
    %c0_i32 = arith.constant 0 : i32
    %0 = arith.cmpi eq, %arg1, %c0_i32 : i32
    %1 = arith.extui %0 : i1 to i32
    %c0_i32_0 = arith.constant 0 : i32
    %2 = arith.cmpi ne, %1, %c0_i32_0 : i32
    scf.if %2 {
      %cst = arith.constant 0.000000e+00 : f32
      %14 = vector.broadcast %cst : f32 to vector<1x8x128xf32>
      %c0 = arith.constant 0 : index
      %c0_7 = arith.constant 0 : index
      %c0_8 = arith.constant 0 : index
      %15 = vector.load %arg4[%c0, %c0_7, %c0_8] : memref<1x8x128xf32, #tpu.memory_space<vmem>>, vector<1x8x128xf32>
      tpu.vector_store %arg4[%c0, %c0_7, %c0_8], %14 {strides = array<i32>} : memref<1x8x128xf32, #tpu.memory_space<vmem>>, vector<1x8x128xf32>,
    } else {
    }
    %c1_i32 = arith.constant 1 : i32
    %3 = arith.muli %arg0, %c1_i32 : i32
    %4 = arith.addi %3, %arg1 : i32
    %c16_i32 = arith.constant 16 : i32
    %5 = arith.muli %4, %c16_i32 : i32
    %c16_i32_1 = arith.constant 16 : i32
    %6 = arith.addi %5, %c16_i32_1 : i32
    %c16_i32_2 = arith.constant 16 : i32
    %7 = arith.cmpi sle, %6, %c16_i32_2 : i32
    %8 = arith.extui %7 : i1 to i32
    %c0_i32_3 = arith.constant 0 : i32
    %9 = arith.cmpi ne, %8, %c0_i32_3 : i32
    scf.if %9 {
      %c0 = arith.constant 0 : index
      %c0_7 = arith.constant 0 : index
      %14 = vector.load %arg2[%c0, %c0_7] : memref<16x128xf32, #tpu.memory_space<vmem>>, vector<16x128xf32>
      %c0_8 = arith.constant 0 : index
      %c0_9 = arith.constant 0 : index
      %15 = vector.load %arg3[%c0_8, %c0_9] : memref<16x128xf32, #tpu.memory_space<vmem>>, vector<16x128xf32>
      %cst = arith.constant 0.000000e+00 : f32
      %16 = vector.broadcast %cst : f32 to vector<16x128xf32>
      %17 = arith.maximumf %14, %16 : vector<16x128xf32>
      %18 = arith.mulf %14, %15 : vector<16x128xf32>
      %19 = arith.subf %17, %18 : vector<16x128xf32>
      %20 = math.absf %14 : vector<16x128xf32>
      %cst_10 = arith.constant 0.000000e+00 : f32
      %21 = vector.broadcast %cst_10 : f32 to vector<16x128xf32>
      %22 = arith.subf %21, %20 : vector<16x128xf32>
      %23 = math.exp %22 : vector<16x128xf32>
      %24 = math.log1p %23 : vector<16x128xf32>
      %25 = arith.addf %19, %24 : vector<16x128xf32>
      %cst_11 = arith.constant 0.000000e+00 : f32
      %26 = vector.broadcast %cst_11 : f32 to vector<16x128xf32>
      %27 = arith.subf %26, %25 : vector<16x128xf32>
      %28 = math.exp %27 : vector<16x128xf32>
      %cst_12 = arith.constant 1.000000e+00 : f32
      %29 = vector.broadcast %cst_12 : f32 to vector<16x128xf32>
      %30 = arith.subf %29, %28 : vector<16x128xf32>
      %31 = arith.mulf %30, %30 : vector<16x128xf32>
      %cst_13 = arith.constant 2.500000e-01 : f32
      %32 = vector.broadcast %cst_13 : f32 to vector<16x128xf32>
      %33 = arith.mulf %32, %31 : vector<16x128xf32>
      %34 = arith.mulf %33, %25 : vector<16x128xf32>
      %35 = vector.shape_cast %34 : vector<16x128xf32> to vector<2x8x128xf32>
      %cst_14 = arith.constant dense<0.000000e+00> : vector<8x128xf32>
      %36 = vector.multi_reduction <add>, %35, %cst_14 [0] : vector<2x8x128xf32> to vector<8x128xf32>
      %c0_15 = arith.constant 0 : index
      %c0_16 = arith.constant 0 : index
      %c0_17 = arith.constant 0 : index
      %37 = vector.load %arg4[%c0_15, %c0_16, %c0_17] : memref<1x8x128xf32, #tpu.memory_space<vmem>>, vector<1x8x128xf32>
      %38 = vector.shape_cast %36 : vector<8x128xf32> to vector<1x8x128xf32>
      %39 = arith.addf %37, %38 : vector<1x8x128xf32>
      %c0_18 = arith.constant 0 : index
      %c0_19 = arith.constant 0 : index
      %c0_20 = arith.constant 0 : index
      %40 = vector.load %arg4[%c0_18, %c0_19, %c0_20] : memref<1x8x128xf32, #tpu.memory_space<vmem>>, vector<1x8x128xf32>
      tpu.vector_store %arg4[%c0_18, %c0_19, %c0_20], %39 {strides = array<i32>} : memref<1x8x128xf32, #tpu.memory_space<vmem>>, vector<1x8x128xf32>,
    } else {
    }
    %c16_i32_4 = arith.constant 16 : i32
    %10 = arith.addi %5, %c16_i32_4 : i32
    %c16_i32_5 = arith.constant 16 : i32
    %11 = arith.cmpi sgt, %10, %c16_i32_5 : i32
    %12 = arith.extui %11 : i1 to i32
    %c0_i32_6 = arith.constant 0 : i32
    %13 = arith.cmpi ne, %12, %c0_i32_6 : i32
    scf.if %13 {
      %c0 = arith.constant 0 : index
      %c0_7 = arith.constant 0 : index
      %14 = vector.load %arg2[%c0, %c0_7] : memref<16x128xf32, #tpu.memory_space<vmem>>, vector<16x128xf32>
      %c0_8 = arith.constant 0 : index
      %c0_9 = arith.constant 0 : index
      %15 = vector.load %arg3[%c0_8, %c0_9] : memref<16x128xf32, #tpu.memory_space<vmem>>, vector<16x128xf32>
      %16 = tpu.iota {dimensions = array<i32: 0>} : vector<16x128xi32>
      %17 = vector.broadcast %5 : i32 to vector<16x128xi32>
      %18 = arith.addi %17, %16 : vector<16x128xi32>
      %c16_i32_10 = arith.constant 16 : i32
      %19 = vector.broadcast %c16_i32_10 : i32 to vector<16x128xi32>
      %20 = arith.cmpi slt, %18, %19 : vector<16x128xi32>
      %cst = arith.constant 0.000000e+00 : f32
      %21 = vector.broadcast %cst : f32 to vector<16x128xf32>
      %22 = arith.select %20, %14, %21 : vector<16x128xi1>, vector<16x128xf32>
      %cst_11 = arith.constant 0.000000e+00 : f32
      %23 = vector.broadcast %cst_11 : f32 to vector<16x128xf32>
      %24 = arith.select %20, %15, %23 : vector<16x128xi1>, vector<16x128xf32>
      %cst_12 = arith.constant 0.000000e+00 : f32
      %25 = vector.broadcast %cst_12 : f32 to vector<16x128xf32>
      %26 = arith.maximumf %22, %25 : vector<16x128xf32>
      %27 = arith.mulf %22, %24 : vector<16x128xf32>
      %28 = arith.subf %26, %27 : vector<16x128xf32>
      %29 = math.absf %22 : vector<16x128xf32>
      %cst_13 = arith.constant 0.000000e+00 : f32
      %30 = vector.broadcast %cst_13 : f32 to vector<16x128xf32>
      %31 = arith.subf %30, %29 : vector<16x128xf32>
      %32 = math.exp %31 : vector<16x128xf32>
      %33 = math.log1p %32 : vector<16x128xf32>
      %34 = arith.addf %28, %33 : vector<16x128xf32>
      %cst_14 = arith.constant 0.000000e+00 : f32
      %35 = vector.broadcast %cst_14 : f32 to vector<16x128xf32>
      %36 = arith.subf %35, %34 : vector<16x128xf32>
      %37 = math.exp %36 : vector<16x128xf32>
      %cst_15 = arith.constant 1.000000e+00 : f32
      %38 = vector.broadcast %cst_15 : f32 to vector<16x128xf32>
      %39 = arith.subf %38, %37 : vector<16x128xf32>
      %40 = arith.mulf %39, %39 : vector<16x128xf32>
      %cst_16 = arith.constant 2.500000e-01 : f32
      %41 = vector.broadcast %cst_16 : f32 to vector<16x128xf32>
      %42 = arith.mulf %41, %40 : vector<16x128xf32>
      %43 = arith.mulf %42, %34 : vector<16x128xf32>
      %cst_17 = arith.constant 0.000000e+00 : f32
      %44 = vector.broadcast %cst_17 : f32 to vector<16x128xf32>
      %45 = arith.select %20, %43, %44 : vector<16x128xi1>, vector<16x128xf32>
      %46 = vector.shape_cast %45 : vector<16x128xf32> to vector<2x8x128xf32>
      %cst_18 = arith.constant dense<0.000000e+00> : vector<8x128xf32>
      %47 = vector.multi_reduction <add>, %46, %cst_18 [0] : vector<2x8x128xf32> to vector<8x128xf32>
      %c0_19 = arith.constant 0 : index
      %c0_20 = arith.constant 0 : index
      %c0_21 = arith.constant 0 : index
      %48 = vector.load %arg4[%c0_19, %c0_20, %c0_21] : memref<1x8x128xf32, #tpu.memory_space<vmem>>, vector<1x8x128xf32>
      %49 = vector.shape_cast %47 : vector<8x128xf32> to vector<1x8x128xf32>
      %50 = arith.addf %48, %49 : vector<1x8x128xf32>
      %c0_22 = arith.constant 0 : index
      %c0_23 = arith.constant 0 : index
      %c0_24 = arith.constant 0 : index
      %51 = vector.load %arg4[%c0_22, %c0_23, %c0_24] : memref<1x8x128xf32, #tpu.memory_space<vmem>>, vector<1x8x128xf32>
      tpu.vector_store %arg4[%c0_22, %c0_23, %c0_24], %50 {strides = array<i32>} : memref<1x8x128xf32, #tpu.memory_space<vmem>>, vector<1x8x128xf32>,
    } else {
    }
    return
  }
  func.func @transform_0(%arg0: i32, %arg1: i32) -> (i32, i32) {
    %c1_i32 = arith.constant 1 : i32
    %0 = arith.muli %arg0, %c1_i32 : i32
    %1 = arith.addi %0, %arg1 : i32
    %c0_i32 = arith.constant 0 : i32
    %2 = arith.minsi %1, %c0_i32 : i32
    %c0_i32_0 = arith.constant 0 : i32
    %c0_i32_1 = arith.constant 0 : i32
    return %2, %c0_i32_0 : i32, i32
  }
  func.func @transform_1(%arg0: i32, %arg1: i32) -> (i32, i32) {
    %c1_i32 = arith.constant 1 : i32
    %0 = arith.muli %arg0, %c1_i32 : i32
    %1 = arith.addi %0, %arg1 : i32
    %c0_i32 = arith.constant 0 : i32
    %2 = arith.minsi %1, %c0_i32 : i32
    %c0_i32_0 = arith.constant 0 : i32
    %c0_i32_1 = arith.constant 0 : i32
    return %2, %c0_i32_0 : i32, i32
  }
  func.func @transform_2(%arg0: i32, %arg1: i32) -> (i32, i32, i32) {
    %c0_i32 = arith.constant 0 : i32
    %c0_i32_0 = arith.constant 0 : i32
    %c0_i32_1 = arith.constant 0 : i32
    return %arg0, %c0_i32, %c0_i32_0 : i32, i32, i32
  }
}

</mosaic_0001>

<bundles_post_ra>
// kernel: tpu_custom_call.1
= control target key start
LH: loop header
LB: loop body
LE: loop exit
PB: predicated region body
PF: predicated region fallthrough
CT: control target
= control target key end

     0   :  { %7 = vsyncpa [#allocation3], 0  ;;  %s353_s0 = inlined_call_operand.hbm [shape: f32[16,128], index: 0, kind: input, shape index: {}]   ;;  %s354_s1 = inlined_call_operand.hbm [shape: f32[16,128], index: 1, kind: input, shape index: {}]   ;;  %s355_s2 = inlined_call_operand.hbm [shape: f32[1,8,128], index: 2, kind: output, shape index: {}]  }
   0x1   :  { %8 = vsyncpa [#allocation6], 0 }
   0x2   :  { %9 = vsyncpa [#allocation4], 0  ;;  %s20_s11 = sshll.u32 %s353_s0, 4  ;;  %s324_s12 = smov [#allocation2]   ;;  %s21_s11 = int_to_ptr.hbm [resolvable:$true] %s20_s11 }
   0x3   :  { %s22_s13 = sshll.u32 %s324_s12, 4  ;;  %s39_s16 = sshll.u32 %s354_s1, 4  ;;  %s23_s13 = int_to_ptr.vmem [resolvable:$true] %s22_s13  ;;  %s40_s16 = int_to_ptr.hbm [resolvable:$true] %s39_s16 }
   0x4   :  { %s325_s17 = smov 128   ;;  %s326_s18 = smov 8  }
   0x5   :  { %28 = dma.hbm_to_vmem [thread:$0]  %s21_s11, 256, %s23_s13, [#allocation3], %s325_s17, %s325_s17, %s326_s18  }
   0x6   :  { %s327_s19 = smov [#allocation5]  }
   0x7   :  { %s41_s20 = sshll.u32 %s327_s19, 4  ;;  %s42_s20 = int_to_ptr.vmem [resolvable:$true] %s41_s20 }
   0x8   :  { %47 = dma.hbm_to_vmem [thread:$0]  %s40_s16, 256, %s42_s20, [#allocation6], %s325_s17, %s325_s17, %s326_s18  }
   0x9   :  { %318 = dma.done.wait [#allocation3], 256  }
   0xa   :  { %319 = vsyncadd [#allocation3], 4294967040 }
   0xb   :  { %320 = dma.done.wait [#allocation6], 256  }
   0xc   :  { %321 = vsyncadd [#allocation6], 4294967040  ;;  %v76_v0 = vld [vmem:[#allocation2] sm:$0xff]  ;;  %v77_v1 = vld [vmem:[#allocation2 + $0x8] sm:$0xff]  ;;  %s328_s0 = smov [#allocation7]   ;;  %s213_s23 = sshll.u32 %s355_s2, 4  ;;  %s214_s23 = int_to_ptr.hbm [resolvable:$true] %s213_s23 }
   0xd   :  { %v86_v2 = vand.u32 2147483647, %v76_v0  ;;  %v87_v3 = vand.u32 2147483647, %v77_v1  ;;  %v78_v12 = vld [vmem:[#allocation5] sm:$0xff]  ;;  %v79_v15 = vld [vmem:[#allocation5 + $0x8] sm:$0xff] }
   0xe   :  { %v80_v17 = vmax.f32 %v76_v0, 0.0  ;;  %v82_v18 = vmul.f32 %v78_v12, %v76_v0  ;;  %v81_v21 = vmax.f32 %v77_v1, 0.0  ;;  %v83_v22 = vmul.f32 %v79_v15, %v77_v1  ;;  %s211_s1 = sshll.u32 %s328_s0, 4  ;;  %s212_s1 = int_to_ptr.vmem [resolvable:$true] %s211_s1 }
   0xf   :  { %v88_v4 = vsub.f32 0.0, %v86_v2  ;;  %v89_v5 = vsub.f32 0.0, %v87_v3 }
  0x10   :  { %v84_v26 = vsub.f32 %v80_v17, %v82_v18  ;;  %v85_v29 = vsub.f32 %v81_v21, %v83_v22 }
  0x11   :  { %v90_v6 = vmul.f32 1.442695, %v88_v4  ;;  %v92_v7 = vmul.f32 1.442695, %v89_v5 }
  0x13   :  { %234 = vpow2.f32 %v90_v6 }
  0x14   :  { %236 = vpow2.f32 %v92_v7 }
  0x19   :  { %v235_v8 = vpop.eup %234 }
  0x1a   :  { %v237_v9 = vpop.eup %236  ;;  %v94_v10 = vadd.f32 1.0, %v235_v8  ;;  %v97_v11 = vmul.f32 -0.5, %v235_v8  ;;  %v100_v19 = vand.u32 2147483647, %v235_v8 }
  0x1b   :  { %v103_v13 = vadd.f32 1.0, %v237_v9  ;;  %v106_v14 = vmul.f32 -0.5, %v237_v9  ;;  %v109_v23 = vand.u32 2147483647, %v237_v9 }
  0x1c   :  { %238 = vlog2.f32 %v94_v10  ;;  %v98_v16 = vadd.f32 1.0, %v97_v11  ;;  %vm101_vm0 = vcmp.lt.f32.partialorder %v100_v19, 0.0004427343 }
  0x1d   :  { %240 = vlog2.f32 %v103_v13  ;;  %v107_v20 = vadd.f32 1.0, %v106_v14  ;;  %vm110_vm1 = vcmp.lt.f32.partialorder %v109_v23, 0.0004427343 }
  0x1e   :  { %v99_v24 = vmul.f32 %v235_v8, %v98_v16 }
  0x1f   :  { %v108_v27 = vmul.f32 %v237_v9, %v107_v20 }
  0x22   :  { %v239_v25 = vpop.eup %238 }
  0x23   :  { %v241_v28 = vpop.eup %240  ;;  %v96_v30 = vmul.f32 0.6931472, %v239_v25 }
  0x24   :  { %v105_v31 = vmul.f32 0.6931472, %v241_v28 }
  0x25   :  { %v102_v32 = vsel %vm101_vm0, %v99_v24, %v96_v30 }
  0x26   :  { %v111_v33 = vsel %vm110_vm1, %v108_v27, %v105_v31  ;;  %v112_v34 = vadd.f32 %v102_v32, %v84_v26 }
  0x27   :  { %v113_v35 = vadd.f32 %v111_v33, %v85_v29 }
  0x28   :  { %v114_v36 = vsub.f32 0.0, %v112_v34 }
  0x29   :  { %v115_v37 = vsub.f32 0.0, %v113_v35 }
  0x2a   :  { %v116_v38 = vmul.f32 1.442695, %v114_v36 }
  0x2b   :  { %v118_v39 = vmul.f32 1.442695, %v115_v37 }
  0x2c   :  { %242 = vpow2.f32 %v116_v38 }
  0x2d   :  { %244 = vpow2.f32 %v118_v39 }
  0x32   :  { %v243_v40 = vpop.eup %242 }
  0x33   :  { %v245_v41 = vpop.eup %244  ;;  %v120_v42 = vsub.f32 1.0, %v243_v40 }
  0x34   :  { %v121_v43 = vsub.f32 1.0, %v245_v41 }
  0x35   :  { %v122_v44 = vmul.f32 %v120_v42, %v120_v42 }
  0x36   :  { %v123_v45 = vmul.f32 %v121_v43, %v121_v43 }
  0x37   :  { %v124_v46 = vmul.f32 0.25, %v122_v44 }
  0x38   :  { %v125_v47 = vmul.f32 0.25, %v123_v45 }
  0x39   :  { %v126_v48 = vmul.f32 %v124_v46, %v112_v34 }
  0x3a   :  { %v127_v49 = vmul.f32 %v125_v47, %v113_v35 }
  0x3c   :  { %v128_v50 = vadd.f32 %v127_v49, %v126_v48 }
  0x3e   :  { %131 = vst [vmem:[#allocation7] sm:$0xff] %v128_v50 }
  0x3f   :  { %216 = dma.vmem_to_hbm [thread:$0]  %s212_s1, 128, %s214_s23, [#allocation4]  }
  0x40   :  { %322 = dma.done.wait [#allocation4], 128  }
  0x41   :  { %323 = vsyncadd [#allocation4], 4294967168 }
  0x42   :  { %221 = vsyncpa [#allocation3], 1 }
  0x43   :  { %222 = vsyncpa [#allocation6], 1 }
  0x44   :  { %223 = vsyncpa [#allocation4], 1 }

</bundles_post_ra>
